<compile_context>
chip_gen: v6e
topology: v6e:2x2x1
jax: 0.10.0
libtpu: 0.0.40
codegen_flags: <defaults>
</compile_context>

<pallas_src>
import functools

import jax
import jax.numpy as jnp
import numpy as np
from jax.experimental import pallas as pl
from jax.experimental.pallas import tpu as pltpu

NEG_SLOPE = 0.01          # nn.LeakyReLU default negative slope
KSIZES = (1, 3, 5)        # inception branch kernel sizes (temporal/causal)
K_TOTAL = KSIZES[-1]      # causal taps after branch merging


def _tcn_kernel(w_ref, b_ref, x_ref, out_ref):
  """Fused inception TCN + LeakyReLU + channel-sum, lane-dense layout.

  w_ref:   (H, K*C)  merged branch weights, transposed (bf16, resident)
  b_ref:   (H, 1)    merged bias (f32, resident)
  x_ref:   (K*C, T)  im2col'd causal-tap input block, T lanes (bf16)
  out_ref: (1, T)    sum over hidden channels (f32, lane-dense store)
  """
  # (H, K*C) @ (K*C, T) -> (H, T): H=8 on sublanes, T (>=128) fills lanes.
  y = jnp.dot(w_ref[...], x_ref[...], preferred_element_type=jnp.float32)
  y = y + b_ref[...]                                 # bias broadcast over lanes
  y = jnp.where(y > 0, y, NEG_SLOPE * y)             # LeakyReLU
  out_ref[...] = jnp.sum(y, axis=0, keepdims=True)   # reduce over hidden dim


def init_params(key, in_channels, hid_channels):
  """Deterministic parameter init for the three inception branches."""
  params = []
  for i, k in enumerate(KSIZES):
    kw, kb = jax.random.split(jax.random.fold_in(key, i))
    w = (jax.random.normal(kw, (k, in_channels, hid_channels), jnp.float32)
         * (1.0 / np.sqrt(k * in_channels)))
    b = jax.random.normal(kb, (1, hid_channels), jnp.float32) * 0.01
    params += [w, b]
  return tuple(params)


def _merge_params(params, c_in):
  """Branches are summed pre-activation, so per-tap weights add exactly."""
  w1, b1, w2, b2, w3, b3 = params
  hid = w1.shape[-1]
  w_eff = jnp.zeros((K_TOTAL, c_in, hid), jnp.float32)
  w_eff = w_eff.at[:KSIZES[0]].add(w1)
  w_eff = w_eff.at[:KSIZES[1]].add(w2)
  w_eff = w_eff.at[:KSIZES[2]].add(w3)
  b_eff = (b1 + b2 + b3).reshape(hid, 1)              # (H, 1) f32
  w_t = w_eff.reshape(K_TOTAL * c_in, hid).T          # (H, K*C) f32
  return w_t, b_eff


def _im2col(xr, seq_len):
  """xr: (M, L, C) -> (M, L, K*C), causal (left-zero-padded) taps, tap-major."""
  taps = [xr]
  for t in range(1, K_TOTAL):
    taps.append(jnp.pad(xr, ((0, 0), (t, 0), (0, 0)))[:, :seq_len, :])
  return jnp.concatenate(taps, axis=-1)


def _choose_tile(total, max_tile, target_steps=8):
  """Lane-tile: multiple of 128, big enough to amortize per-step overhead,
  but keep >= ~8 grid steps when possible so v7x can shard across its 2 TCs."""
  t = -(-total // target_steps)
  t = ((t + 127) // 128) * 128
  return max(128, min(max_tile, t))


@functools.partial(jax.jit, static_argnames=("max_tile",))
def prediction_encoder(inputs, params, *, max_tile=65536):
  """inputs: (B, N, F, L, C) float32 -> out: (B, N, 2, L) float32."""
  # --- glue (matches the PyTorch forward's indexing) ---
  x = inputs[:, :, 0:2, :, :]            # inputs[:, :, 0:2, :, :]
  x = x[:, :, :, ::-1, :]                # reverse along seq_len (dim=3)
  b, n, f, seq_len, c_in = x.shape
  m = b * n * f

  # One-time XLA prep: im2col + transpose (lane-dense) + bf16 for HBM traffic.
  xr = x.reshape(m, seq_len, c_in).astype(jnp.float32)
  x_unf = _im2col(xr, seq_len)                               # (M, L, K*C)
  x_t = x_unf.reshape(m * seq_len, K_TOTAL * c_in).T         # (K*C, M*L)
  x_t = x_t.astype(jnp.bfloat16)

  w_t, b_eff = _merge_params(params, c_in)
  w_t = w_t.astype(jnp.bfloat16)
  hid = w_t.shape[0]

  total = m * seq_len
  tile = _choose_tile(total, max_tile)
  padded = pl.cdiv(total, tile) * tile
  if padded != total:                    # zero-pad lanes; tail sliced off below
    x_t = jnp.pad(x_t, ((0, 0), (0, padded - total)))

  out = pl.pallas_call(
      _tcn_kernel,
      out_shape=jax.ShapeDtypeStruct((1, padded), jnp.float32),
      grid=(padded // tile,),
      in_specs=[
          pl.BlockSpec((hid, K_TOTAL * c_in), lambda i: (0, 0)),   # weights
          pl.BlockSpec((hid, 1), lambda i: (0, 0)),                # bias
          pl.BlockSpec((K_TOTAL * c_in, tile), lambda i: (0, i)),  # x block
      ],
      out_specs=pl.BlockSpec((1, tile), lambda i: (0, i)),
      compiler_params=pltpu.CompilerParams(
          dimension_semantics=("parallel",)),
  )(w_t, b_eff, x_t)

  return out[0, :total].reshape(b, n, f, seq_len)


def prediction_encoder_ref(inputs, params):
  """Pure-JAX reference mirroring the kernel math (bf16 x/w, f32 accumulate)."""
  x = inputs[:, :, 0:2, :, :][:, :, :, ::-1, :]
  b, n, f, seq_len, c_in = x.shape
  xr = x.reshape(b * n * f, seq_len, c_in).astype(jnp.float32)
  x_unf = _im2col(xr, seq_len).astype(jnp.bfloat16)          # (M, L, K*C)
  w_t, b_eff = _merge_params(params, c_in)
  w_flat = w_t.T.astype(jnp.bfloat16)                        # (K*C, H)
  y = jnp.einsum("mlk,kh->mlh", x_unf, w_flat,
                 preferred_element_type=jnp.float32)
  y = y + b_eff[:, 0][None, None, :]
  y = jnp.where(y > 0, y, NEG_SLOPE * y)
  return jnp.sum(y, axis=-1).reshape(b, n, f, seq_len)


def prediction_encoder_ref_f32(inputs, params):
  """Full-f32, unmerged 3-branch semantic reference (for a loose sanity check)."""
  x = inputs[:, :, 0:2, :, :][:, :, :, ::-1, :]
  b, n, f, seq_len, c_in = x.shape
  xr = x.reshape(b * n * f, seq_len, c_in).astype(jnp.float32)
  w1, b1, w2, b2, w3, b3 = params

  def branch(w, bias):
    k = w.shape[0]
    acc = jnp.zeros((xr.shape[0], seq_len, w.shape[-1]), jnp.float32)
    for t in range(k):
      xt = jnp.pad(xr, ((0, 0), (t, 0), (0, 0)))[:, :seq_len, :]
      acc = acc + jnp.einsum("mlc,ch->mlh", xt, w[t])
    return acc + bias[0][None, None, :]

  y = branch(w1, b1) + branch(w2, b2) + branch(w3, b3)
  y = jnp.where(y > 0, y, NEG_SLOPE * y)
  return jnp.sum(y, axis=-1).reshape(b, n, f, seq_len)


if __name__ == "__main__":
  key = jax.random.PRNGKey(0)
  k_in, k_par = jax.random.split(key)

  B, N, F, L, C_IN, HID = 2, 5, 3, 12, 4, 8   # num_stations=5, seq_len=12
  inputs = jax.random.normal(k_in, (B, N, F, L, C_IN), jnp.float32)
  params = init_params(k_par, C_IN, HID)

  out = jax.block_until_ready(prediction_encoder(inputs, params))
  assert out.shape == (B, N, 2, L), out.shape

  # Tight check against a reference mirroring the kernel's bf16/f32 math path.
  ref = prediction_encoder_ref(inputs, params)
  np.testing.assert_allclose(np.asarray(out), np.asarray(ref),
                             rtol=1e-4, atol=1e-4)

  # Loose check against the full-f32, unmerged 3-branch semantic reference
  # (difference is only the bf16 input/weight cast).
  ref32 = prediction_encoder_ref_f32(inputs, params)
  np.testing.assert_allclose(np.asarray(out), np.asarray(ref32),
                             rtol=1e-1, atol=1e-1)

  print("KERNEL_OK")
</pallas_src>

<mosaic_0001>
module attributes {stable_mosaic.version = 11 : i64} {
  func.func @_tcn_kernel(%arg0: i32, %arg1: memref<8x20xbf16, #tpu.memory_space<vmem>>, %arg2: memref<8x1xf32, #tpu.memory_space<vmem>>, %arg3: memref<20x128xbf16, #tpu.memory_space<vmem>>, %arg4: memref<1x128xf32, #tpu.memory_space<vmem>>) attributes {dimension_semantics = [#tpu.dimension_semantics<parallel>], iteration_bounds = array<i64: 2>, scalar_prefetch = 0 : i64, scratch_operands = 0 : i64, tpu.core_type = #tpu.core_type<tc>, window_params = [{pipeline_mode = #tpu.pipeline_mode<synchronous>, transform_indices = @transform_0, window_bounds = array<i64: 8, 20>}, {pipeline_mode = #tpu.pipeline_mode<synchronous>, transform_indices = @transform_1, window_bounds = array<i64: 8, 1>}, {transform_indices = @transform_2, window_bounds = array<i64: 20, 128>}, {transform_indices = @transform_3, window_bounds = array<i64: 1, 128>}]} {
    %c0 = arith.constant 0 : index
    %c0_0 = arith.constant 0 : index
    %0 = vector.load %arg1[%c0, %c0_0] : memref<8x20xbf16, #tpu.memory_space<vmem>>, vector<8x20xbf16>
    %c0_1 = arith.constant 0 : index
    %c0_2 = arith.constant 0 : index
    %1 = vector.load %arg3[%c0_1, %c0_2] : memref<20x128xbf16, #tpu.memory_space<vmem>>, vector<20x128xbf16>
    %cst = arith.constant dense<0.000000e+00> : vector<8x128xf32>
    %2 = tpu.matmul %0, %1, %cst {dimension_numbers = #tpu.dot_dimension_numbers<[1], [0], [0], [1], [0, 0, 1, 1], [], []>} : vector<8x20xbf16>, vector<20x128xbf16>, vector<8x128xf32> -> vector<8x128xf32>
    %c0_3 = arith.constant 0 : index
    %c0_4 = arith.constant 0 : index
    %3 = vector.load %arg2[%c0_3, %c0_4] : memref<8x1xf32, #tpu.memory_space<vmem>>, vector<8x1xf32>
    %4 = vector.broadcast %3 : vector<8x1xf32> to vector<8x128xf32>
    %5 = arith.addf %2, %4 : vector<8x128xf32>
    %cst_5 = arith.constant 0.000000e+00 : f32
    %6 = vector.broadcast %cst_5 : f32 to vector<8x128xf32>
    %7 = arith.cmpf ogt, %5, %6 : vector<8x128xf32>
    %cst_6 = arith.constant 0.00999999977 : f32
    %8 = vector.broadcast %cst_6 : f32 to vector<8x128xf32>
    %9 = arith.mulf %8, %5 : vector<8x128xf32>
    %10 = arith.select %7, %5, %9 : vector<8x128xi1>, vector<8x128xf32>
    %cst_7 = arith.constant dense<0.000000e+00> : vector<128xf32>
    %11 = vector.multi_reduction <add>, %10, %cst_7 [0] : vector<8x128xf32> to vector<128xf32>
    %12 = vector.shape_cast %11 : vector<128xf32> to vector<1x128xf32>
    %c0_8 = arith.constant 0 : index
    %c0_9 = arith.constant 0 : index
    %13 = vector.load %arg4[%c0_8, %c0_9] : memref<1x128xf32, #tpu.memory_space<vmem>>, vector<1x128xf32>
    tpu.vector_store %arg4[%c0_8, %c0_9], %12 {strides = array<i32>} : memref<1x128xf32, #tpu.memory_space<vmem>>, vector<1x128xf32>,
    return
  }
  func.func @transform_0(%arg0: i32) -> (i32, i32) {
    %c0_i32 = arith.constant 0 : i32
    %c0_i32_0 = arith.constant 0 : i32
    %c0_i32_1 = arith.constant 0 : i32
    return %c0_i32, %c0_i32_0 : i32, i32
  }
  func.func @transform_1(%arg0: i32) -> (i32, i32) {
    %c0_i32 = arith.constant 0 : i32
    %c0_i32_0 = arith.constant 0 : i32
    %c0_i32_1 = arith.constant 0 : i32
    return %c0_i32, %c0_i32_0 : i32, i32
  }
  func.func @transform_2(%arg0: i32) -> (i32, i32) {
    %c0_i32 = arith.constant 0 : i32
    %c0_i32_0 = arith.constant 0 : i32
    return %c0_i32, %arg0 : i32, i32
  }
  func.func @transform_3(%arg0: i32) -> (i32, i32) {
    %c0_i32 = arith.constant 0 : i32
    %c0_i32_0 = arith.constant 0 : i32
    return %c0_i32, %arg0 : i32, i32
  }
}

</mosaic_0001>

<bundles_post_ra>
// kernel: squeeze.1
= control target key start
LH: loop header
LB: loop body
LE: loop exit
PB: predicated region body
PF: predicated region fallthrough
CT: control target
= control target key end

     0   :  { %s326_s0 = inlined_call_operand.vmem [shape: f32[240], index: 0, kind: input, shape index: {}]   ;;  %s327_s1 = inlined_call_operand.hbm [shape: f32[2,5,2,12], index: 1, kind: output, shape index: {}]  }
   0x1   :  { %v6_v0 = vld [vmem:[%s326_s0] sm:$0x3] }
   0x2   :  { %7 = vst [vmem:[#allocation3] sm:$0x3] %v6_v0 }
   0x3   :  { %2 = vsyncpa [#allocation1], 0  ;;  %s271_s0 = smov 116   ;;  %s272_s8 = smov 124   ;;  %vm131_vm0 = vcmask 982016   ;;  %vm9_vm1 = vcmask 97280  }
   0x4   :  { %s273_s9 = smov 112   ;;  %s274_s10 = smov 104   ;;  %vm135_vm2 = vcmask 64512   ;;  %vm138_vm3 = vcmask 97344  }
   0x5   :  { %s275_s11 = smov 100   ;;  %s276_s12 = smov 8  }
   0x6   :  { %s277_s13 = smov 88   ;;  %s278_s14 = smov 92  }
   0x7   :  { %s279_s15 = smov 76   ;;  %s280_s16 = smov 80  }
   0x8   :  { %s281_s17 = smov 64   ;;  %s282_s18 = smov 68  }
   0x9   :  { %v18_v1 = vld [vmem:[#allocation3] sm:$0x1]   ;;  %v12_v2 = vld [vmem:[#allocation3 + $0x1] sm:$0x1]   ;;  %s283_s19 = smov 52   ;;  %s284_s20 = smov 56  }
   0xa   :  { %19 = vrot.lane.b32.xlu1 %v18_v1, %s271_s0  ;;  %13 = vrot.lane.b32.xlu0 %v12_v2, %s272_s8  ;;  %v25_v3 = vld [vmem:[#allocation3 + $0x1] sm:$0x1]   ;;  %v31_v4 = vld [vmem:[#allocation3] sm:$0x1]   ;;  %s285_s21 = smov 40   ;;  %s286_s22 = smov 44  }
   0xb   :  { %v128_v5 = vld [vmem:[#allocation3] sm:$0x1]   ;;  %v130_v6 = vld [vmem:[#allocation3 + $0x1] sm:$0x1]   ;;  %s287_s23 = smov 28   ;;  %s288_s24 = smov 32  }
   0xc   :  { %v38_v7 = vld [vmem:[#allocation3 + $0x1] sm:$0x1]   ;;  %v132_v8 = vsel %vm131_vm0, %v130_v6, %v128_v5  ;;  %v8_v9 = vld [vmem:[#allocation3] sm:$0x1]   ;;  %s289_s25 = smov 20   ;;  %s290_s26 = smov [#allocation0]  }
   0xd   :  { %10 = vst.msk [vmem:[#allocation2] sm:$0x1] %vm9_vm1, %v8_v9   ;;  %v51_v10 = vld [vmem:[#allocation3 + $0x1] sm:$0x1]   ;;  %v44_v11 = vld [vmem:[#allocation3] sm:$0x1]  }
   0xe   :  { %26 = vrot.lane.b32.xlu1 %v25_v3, %s273_s9  ;;  %32 = vrot.lane.b32.xlu0 %v31_v4, %s274_s10  ;;  %v64_v12 = vld [vmem:[#allocation3 + $0x1] sm:$0x1]   ;;  %v57_v13 = vld [vmem:[#allocation3] sm:$0x1]   ;;  %s215_s27 = sshll.u32 %s290_s26, 4  ;;  %s216_s27 = int_to_ptr.vmem [resolvable:$true] %s215_s27 }
   0xf   :  { %v77_v14 = vld [vmem:[#allocation3 + $0x1] sm:$0x1]   ;;  %v70_v15 = vld [vmem:[#allocation3] sm:$0x1]   ;;  %s249_s28 = scalar_lea.vmem %s216_s27, 320  ;;  %p254_p1 = scmp.lt.s32.totalorder %s216_s27, %s216_s27 }
  0x10   :  { %v90_v16 = vld [vmem:[#allocation3 + $0x1] sm:$0x1]   ;;  %v83_v17 = vld [vmem:[#allocation3] sm:$0x1]   ;;  %p250_p0 = scmp.ne.s32.totalorder %s216_s27, %s249_s28  ;;  %p255_p2 = scmp.lt.s32.totalorder %s249_s28, %s249_s28 }
  0x11   :  { %v103_v18 = vld [vmem:[#allocation3 + $0x1] sm:$0x1]   ;;  %v96_v19 = vld [vmem:[#allocation3] sm:$0x1]  }
  0x12   :  { %39 = vrot.lane.b32.xlu1 %v38_v7, %s275_s11  ;;  %133 = vrot.lane.b32.xlu0 %v132_v8, %s276_s12  ;;  %v116_v20 = vld [vmem:[#allocation3 + $0x1] sm:$0x1]   ;;  %v109_v21 = vld [vmem:[#allocation3] sm:$0x1]   ;;  %p256_p3 = por %p255_p2, %p254_p1 }
  0x13   :  { %v122_v22 = vld [vmem:[#allocation3] sm:$0x1]  }
  0x14   :  { %p257_p4 = pnand %p256_p3, %p250_p0 }
  0x16   :  { %52 = vrot.lane.b32.xlu1 %v51_v10, %s277_s13  ;;  %45 = vrot.lane.b32.xlu0 %v44_v11, %s278_s14 }
  0x1a   :  { %65 = vrot.lane.b32.xlu1 %v64_v12, %s279_s15  ;;  %58 = vrot.lane.b32.xlu0 %v57_v13, %s280_s16 }
  0x1e   :  { %78 = vrot.lane.b32.xlu1 %v77_v14, %s281_s17  ;;  %71 = vrot.lane.b32.xlu0 %v70_v15, %s282_s18 }
  0x22   :  { %91 = vrot.lane.b32.xlu1 %v90_v16, %s283_s19  ;;  %84 = vrot.lane.b32.xlu0 %v83_v17, %s284_s20 }
  0x26   :  { %104 = vrot.lane.b32.xlu1 %v103_v18, %s285_s21  ;;  %97 = vrot.lane.b32.xlu0 %v96_v19, %s286_s22 }
  0x2a   :  { %117 = vrot.lane.b32.xlu1 %v116_v20, %s287_s23  ;;  %110 = vrot.lane.b32.xlu0 %v109_v21, %s288_s24 }
  0x2e   :  { %123 = vrot.lane.b32.xlu0 %v122_v22, %s289_s25 }
  0x7c   :  { %v20_v23 = vpop.permute.xlu1 %19   ;;  %v14_v24 = vpop.permute.xlu0 %13  }
  0x7d   :  { %23 = vst.msk [vmem:[#allocation2 + $0x1] sm:$0x1] %vm9_vm1, %v20_v23   ;;  %17 = vst.msk [vmem:[#allocation2 + $0x29] sm:$0x1] %vm9_vm1, %v14_v24  }
  0x80   :  { %v27_v25 = vpop.permute.xlu1 %26   ;;  %v33_v26 = vpop.permute.xlu0 %32  }
  0x81   :  { %30 = vst.msk [vmem:[#allocation2 + $0x30] sm:$0x1] %vm9_vm1, %v27_v25   ;;  %36 = vst.msk [vmem:[#allocation2 + $0x8] sm:$0x1] %vm9_vm1, %v33_v26  }
  0x84   :  { %v145_v27 = vld [vmem:[#allocation2] sm:$0x3]  ;;  %v40_v28 = vpop.permute.xlu1 %39   ;;  %v134_v29 = vpop.permute.xlu0 %133  }
  0x85   :  { %148 = vst [vmem:[#allocation0] sm:$0x3] %v145_v27  ;;  %43 = vst.msk [vmem:[#allocation2 + $0x31] sm:$0x1] %vm9_vm1, %v40_v28  }
  0x86   :  { %137 = vst.msk [vmem:[#allocation2 + $0x28] sm:$0x1] %vm135_vm2, %v134_v29  }
  0x87   :  { %140 = vst.msk [vmem:[#allocation2 + $0x28] sm:$0x1] %vm138_vm3, %v134_v29  }
  0x88   :  { %v53_v30 = vpop.permute.xlu1 %52   ;;  %v46_v31 = vpop.permute.xlu0 %45  }
  0x89   :  { %56 = vst.msk [vmem:[#allocation2 + $0x38] sm:$0x1] %vm9_vm1, %v53_v30   ;;  %49 = vst.msk [vmem:[#allocation2 + $0x9] sm:$0x1] %vm9_vm1, %v46_v31  }
  0x8c   :  { %v184_v32 = vld [vmem:[#allocation2 + $0x30] sm:$0x3]  ;;  %v66_v33 = vpop.permute.xlu1 %65   ;;  %v59_v34 = vpop.permute.xlu0 %58  }
  0x8d   :  { %189 = vst [vmem:[#allocation0 + $0xc] sm:$0x3] %v184_v32  ;;  %69 = vst.msk [vmem:[#allocation2 + $0x39] sm:$0x1] %vm9_vm1, %v66_v33  }
  0x8e   :  { %v177_v35 = vld [vmem:[#allocation2 + $0x28] sm:$0x3]  ;;  %62 = vst.msk [vmem:[#allocation2 + $0x10] sm:$0x1] %vm9_vm1, %v59_v34  }
  0x8f   :  { %182 = vst [vmem:[#allocation0 + $0xa] sm:$0x3] %v177_v35 }
  0x90   :  { %v150_v36 = vld [vmem:[#allocation2 + $0x8] sm:$0x3]  ;;  %v79_v37 = vpop.permute.xlu1 %78   ;;  %v72_v38 = vpop.permute.xlu0 %71  }
  0x91   :  { %154 = vst [vmem:[#allocation0 + $0x2] sm:$0x3] %v150_v36  ;;  %82 = vst.msk [vmem:[#allocation2 + $0x40] sm:$0x1] %vm9_vm1, %v79_v37  }
  0x92   :  { %75 = vst.msk [vmem:[#allocation2 + $0x11] sm:$0x1] %vm9_vm1, %v72_v38  }
  0x94   :  { %v191_v39 = vld [vmem:[#allocation2 + $0x38] sm:$0x3]  ;;  %v92_v40 = vpop.permute.xlu1 %91   ;;  %v85_v41 = vpop.permute.xlu0 %84  }
  0x95   :  { %196 = vst [vmem:[#allocation0 + $0xe] sm:$0x3] %v191_v39  ;;  %95 = vst.msk [vmem:[#allocation2 + $0x41] sm:$0x1] %vm9_vm1, %v92_v40  }
  0x96   :  { %88 = vst.msk [vmem:[#allocation2 + $0x18] sm:$0x1] %vm9_vm1, %v85_v41  }
  0x98   :  { %v105_v43 = vpop.permute.xlu1 %104   ;;  %v98_v44 = vpop.permute.xlu0 %97  }
  0x99   :  { %v156_v42 = vld [vmem:[#allocation2 + $0x10] sm:$0x3]  ;;  %108 = vst.msk [vmem:[#allocation2 + $0x48] sm:$0x1] %vm9_vm1, %v105_v43   ;;  %101 = vst.msk [vmem:[#allocation2 + $0x19] sm:$0x1] %vm9_vm1, %v98_v44  }
  0x9a   :  { %161 = vst [vmem:[#allocation0 + $0x4] sm:$0x3] %v156_v42 }
  0x9c   :  { %v198_v45 = vld [vmem:[#allocation2 + $0x40] sm:$0x3]  ;;  %v118_v46 = vpop.permute.xlu1 %117   ;;  %v111_v47 = vpop.permute.xlu0 %110  }
  0x9d   :  { %203 = vst [vmem:[#allocation0 + $0x10] sm:$0x3] %v198_v45  ;;  %121 = vst.msk [vmem:[#allocation2 + $0x49] sm:$0x1] %vm9_vm1, %v118_v46  }
  0x9e   :  { %114 = vst.msk [vmem:[#allocation2 + $0x20] sm:$0x1] %vm9_vm1, %v111_v47  }
  0xa0   :  { %v163_v48 = vld [vmem:[#allocation2 + $0x18] sm:$0x3]  ;;  %v124_v49 = vpop.permute.xlu0 %123  }
  0xa1   :  { %168 = vst [vmem:[#allocation0 + $0x6] sm:$0x3] %v163_v48  ;;  %127 = vst.msk [vmem:[#allocation2 + $0x21] sm:$0x1] %vm9_vm1, %v124_v49  }
  0xa4   :  { %v205_v50 = vld [vmem:[#allocation2 + $0x48] sm:$0x3] }
  0xa5   :  { %210 = vst [vmem:[#allocation0 + $0x12] sm:$0x3] %v205_v50 }
  0xa8   :  { %v170_v51 = vld [vmem:[#allocation2 + $0x20] sm:$0x3] }
  0xa9   :  { %175 = vst [vmem:[#allocation0 + $0x8] sm:$0x3] %v170_v51 }
  0xaa   :  { %260 = shalt.err (!%p257_p4)
}
  0xab   :  { %218 = dma.vmem_to_hbm [thread:$0]  %s216_s27, 320, %s327_s1, [#allocation1]  }
  0xac   :  { %269 = dma.done.wait [#allocation1], 320  }
  0xad   :  { %270 = vsyncadd [#allocation1], 4294966976 }
  0xae   :  { %220 = vsyncpa [#allocation1], 1 }

// kernel: prediction_encoder.1
= control target key start
LH: loop header
LB: loop body
LE: loop exit
PB: predicated region body
PF: predicated region fallthrough
CT: control target
= control target key end

     0   :  { %s450_s12 = smov 0   ;;  %s452_s13 = smov 0   ;;  %s510_s0 = inlined_call_operand.vmem [shape: bf16[8,20], index: 0, kind: input, shape index: {}]   ;;  %s511_s1 = inlined_call_operand.vmem [shape: f32[8,1], index: 1, kind: input, shape index: {}]   ;;  %s512_s2 = inlined_call_operand.vmem [shape: bf16[20,256], index: 2, kind: input, shape index: {}]   ;;  %s513_s3 = inlined_call_operand.vmem [shape: f32[1,256], index: 3, kind: output, shape index: {}]  }
   0x1   :  { %s454_s14 = smov 0  }
   0x2 LB: > { %s349_s15 = sadd.s32 4294967295, %s425_s14   ;;  %s467_s16 = sadd.s32 1, %s425_s14   ;;  %s425_s14 = sphi %s454_s14, %s516_s14   ;;  %s421_s13 = sphi %s452_s13, %s515_s13   ;;  %s417_s12 = sphi %s450_s12, %s514_s12  }
   0x3   : > { %s59_s17 = ssub.s32 %s425_s14, %s467_s16  ;;  %s62_s18 = sadd.s32 1, %s421_s13 }
   0x4   : > { %p60_p0 = scmp.eq.s32.totalorder %s59_s17, 0  ;;  %p69_p1 = scmp.ne.s32.totalorder %s421_s13, %s417_s12 }
   0x5   : > { %p70_p2 = scmp.eq.s32.totalorder %s425_s14, 0  ;;  %p352_p4 = scmp.ge.s32.totalorder %s425_s14, 2 }
   0x6   : > { %s476_s19 = scalar_select %p60_p0, %s421_s13, %s62_s18  }
   0x7   : > { %p71_p3 = por %p70_p2, %p69_p1  ;;  %127 = sbr.rel (%p352_p4) target bundleno = 19 (0x13), region = 24 }
   0xc   : > { %130 = sbr.rel (!%p71_p3) target bundleno = 19 (0x13), region = 28  ;;  %s132_s20 = sand.u32 (%p71_p3), 1, %s421_s13  }
   0xd   : > { %s353_s21 = sshll.u32 (%p71_p3), %s425_s14, 2  ;;  %s371_s22 = smul.u32 (%p71_p3), 12, %s132_s20 }
   0xe   : > { %s136_s25 = scalar_lea.vmem (%p71_p3), %s512_s2, %s353_s21 }
   0xf   : > { %v153_v0 = vld [vmem:[%s136_s25] sm:$0xf] (%p71_p3)  ;;  %v155_v1 = vld [vmem:[%s136_s25 + $0x8] sm:$0xf] (%p71_p3)  ;;  %v157_v2 = vld [vmem:[%s136_s25 + $0x10] sm:$0xf] (%p71_p3) }
  0x10   : > { %s134_s26 = scalar_lea.vmem (%p71_p3), [#allocation2], %s371_s22 }
  0x11   : > { %154 = vst [vmem:[%s134_s26] sm:$0xf] %v153_v0  ;;  %156 = vst [vmem:[%s134_s26 + $0x4] sm:$0xf] %v155_v1 }
  0x12   : > { %158 = vst [vmem:[%s134_s26 + $0x8] sm:$0xf] %v157_v2 }
  0x13 PF: > { %p354_p5 = scmp.ge.s32.totalorder %s425_s14, 1  ;;  %p187_p6 = scmp.lt.s32.totalorder %s425_s14, 3 }
  0x15   : > { %p188_p7 = pnand %p354_p5, %p187_p6 }
  0x16   : > { %s194_s27 = sand.u32 (!%p188_p7), 1, %s417_s12   ;;  %p215_p8 = scmp.lt.s32.totalorder (!%p188_p7), %s349_s15, 1 }
  0x17   : > { %191 = sbr.rel (%p188_p7) target bundleno = 249 (0xf9), region = 69 }
  0x18   : > { %s372_s28 = smul.u32 (!%p188_p7), 12, %s194_s27 }
  0x1a   : > { %s196_s4 = scalar_lea.vmem (!%p188_p7), [#allocation2], %s372_s28 }
  0x1c   : > { %v427_v3 = vmov 0.0   ;;  %vm428_vm0 = vmmov 0   ;;  %v223_v4 = vld [vmem:[%s511_s1] sm:$0xff]  ;;  %v429_v5 = vmov 0   ;;  %vm242_vm1 = vcmask 1041408   ;;  %s518_s15 = smov (!%p215_p8, %s349_s15), 1 }
  0x1d   : > { %363 = vmatprep.subr.bf16.mxu0 %v427_v3  ;;  %367 = vmatprep.mubr.msk.bf16.mxu0 %vm428_vm0, %v427_v3  ;;  %v401_v6 = vld [vmem:[%s196_s4 + $0x8] ss:$0 sps:$4 sm:$0x33]   ;;  %v402_v8 = vld [vmem:[%s196_s4] sm:$0xff]   ;;  %vm238_vm2 = vcmask 162816   ;;  %s217_s9 = scalar_lea.vmem %s513_s3, %s518_s15 }
  0x1e   : > { %400 = vset.pattern.permute.xlu0 %v429_v5  ;;  %v244_v7 = vsel %vm242_vm1, %v401_v6, 0  ;;  %v219_v9 = vld [vmem:[%s510_s0] sm:$0xf] }
  0x1f   : > { %226 = vperm.xlu0 %400, %v223_v4   ;;  %364 = vmatpush3.bf16.msra.mxu0 %v244_v7 }
  0x20   : > { %365 = vmatprep.subr.bf16.mxu0 %v427_v3 }
  0x23   : > { %366 = vmatpush3.bf16.msra.mxu0 %v402_v8 }
  0x26   : > { %368 = vmatmul.mubr.msk.bf16.vlgmr.msra.gmra.mxu0 %vm238_vm2, %v219_v9 }
  0x9a   : > { %v227_v10 = vpop.permute.xlu0 %226 }
  0xe6   : > { %v280_v11 = vpop.f32.mrf.mxu0 }
  0xe7   : > { %v281_v12 = vadd.f32 %v280_v11, %v227_v10 }
  0xe8   : > { %v369_v13 = vpop.f32.mrf.mxu0 }
  0xe9   : > { %vm286_vm3 = vcmp.gt.f32.partialorder %v281_v12, 0.0  ;;  %v287_v14 = vmul.f32 0.01, %v281_v12 }
  0xea   : > { %v283_v15 = vpop.f32.mrf.mxu0 }
  0xeb   : > { %v288_v16 = vsel %vm286_vm3, %v281_v12, %v287_v14 }
  0xec   : > { %v289_v17 = vrot.slane %v288_v16, 4  ;;  %v370_v18 = vpop.f32.mrf.mxu0 }
  0xee   : > { %v290_v19 = vadd.f32 %v289_v17, %v288_v16 }
  0xf0   : > { %v291_v20 = vrot.slane %v290_v19, 2 }
  0xf2   : > { %v292_v21 = vadd.f32 %v291_v20, %v290_v19 }
  0xf4   : > { %v293_v22 = vrot.slane %v292_v21, 1 }
  0xf6   : > { %v294_v23 = vadd.f32 %v293_v22, %v292_v21 }
  0xf8   : > { %295 = vst [vmem:[%s217_s9] sm:$0x1] %v294_v23 }
  0xf9 PF: > { %p10_p9 = scmp.ge.s32.totalorder %s467_s16, 4   ;;  %s514_s12 = smov %s421_s13 }
  0xfa   : > { %s515_s13 = smov %s476_s19  ;;  %s516_s14 = smov %s467_s16 }
  0xfb   :  { %12 = sbr.rel (!%p10_p9) target bundleno = 2 (0x2), region = 108 }

</bundles_post_ra>
